<compile_context>
chip_gen: v7x
topology: tpu7x:2x2x1
jax: 0.10.0
libtpu: 0.0.40
codegen_flags: <defaults>
</compile_context>

<pallas_src>
import jax
import jax.numpy as jnp
from jax.experimental import pallas as pl
from jax.experimental.pallas import tpu as pltpu


# ---------------------------------------------------------------------------
# Pallas kernel: embedding gather as a one-hot MXU matmul with a vocab
# reduction axis.
# ---------------------------------------------------------------------------
def _embedding_onehot_kernel(ids_ref, table_ref, out_ref, acc_ref):
    # ids_ref:   (T, 1)   int32  -- token ids for this token tile (sublanes)
    # table_ref: (TV, D)  f32    -- current vocab tile of the embedding table
    # out_ref:   (T, D)   f32    -- gathered rows (written on last vocab step)
    # acc_ref:   (T, D)   f32    -- VMEM accumulator across vocab tiles
    k = pl.program_id(1)

    @pl.when(k == 0)
    def _():
        acc_ref[...] = jnp.zeros_like(acc_ref)

    ids = ids_ref[...]                                   # (T, 1)
    t = ids.shape[0]
    tv = table_ref.shape[0]
    # Global vocab ids covered by this table tile.
    vocab_iota = k * tv + jax.lax.broadcasted_iota(jnp.int32, (t, tv), 1)
    onehot = (ids == vocab_iota).astype(table_ref.dtype)  # (T, TV)
    acc_ref[...] += jnp.dot(
        onehot, table_ref[...], preferred_element_type=jnp.float32
    )

    @pl.when(k == pl.num_programs(1) - 1)
    def _():
        out_ref[...] = acc_ref[...].astype(out_ref.dtype)


def _round_up(x, m):
    return ((x + m - 1) // m) * m


def embedding_lookup(
    ids_flat,
    table,
    *,
    max_token_tile=512,
    max_table_block_bytes=8 << 20,
):
    """ids_flat: (N,) int token ids; table: (V, D) -> (N, D)."""
    n = int(ids_flat.shape[0])
    vocab, embed_dim = table.shape
    itemsize = jnp.dtype(table.dtype).itemsize

    # ---- token tiling (sublane axis; multiple of 8, capped) ----------------
    t = min(max_token_tile, _round_up(max(n, 1), 8))
    n_pad = _round_up(n, t)
    n_tiles = n_pad // t

    # ---- vocab tiling (reduction axis; table block capped in VMEM bytes) ---
    rows_cap = max(8, ((max_table_block_bytes // (embed_dim * itemsize)) // 8) * 8)
    tv = min(_round_up(vocab, 8), rows_cap)
    v_pad = _round_up(vocab, tv)
    v_tiles = v_pad // tv

    # Clamp ids (guards out-of-range tokens; padded table rows are never hit)
    # and pad to whole token tiles.
    ids = jnp.clip(ids_flat.astype(jnp.int32), 0, vocab - 1)
    ids = jnp.pad(ids, (0, n_pad - n))
    ids_2d = ids.reshape(n_pad, 1)  # ids on the sublane axis

    table_p = table
    if v_pad != vocab:
        table_p = jnp.pad(table, ((0, v_pad - vocab), (0, 0)))

    # ---- explicit VMEM budget ----------------------------------------------
    vmem_bytes = (
        2 * tv * embed_dim * itemsize      # double-buffered table tile
        + 2 * t * 4                        # double-buffered ids tile
        + 2 * t * embed_dim * itemsize     # double-buffered output tile
        + t * embed_dim * 4                # accumulator scratch
        + (4 << 20)                        # compiler-internal headroom
    )
    vmem_limit = int(min(max(vmem_bytes, 32 << 20), 64 << 20))

    out = pl.pallas_call(
        _embedding_onehot_kernel,
        grid=(n_tiles, v_tiles),
        in_specs=[
            # (T, 1) tile of token ids; last dim equals the full (size-1) dim.
            pl.BlockSpec((t, 1), lambda i, k: (i, 0)),
            # (TV, D) vocab tile of the table; constant over i when v_tiles==1
            # (single HBM->VMEM DMA, table stays resident).
            pl.BlockSpec((tv, embed_dim), lambda i, k: (k, 0)),
        ],
        out_specs=pl.BlockSpec((t, embed_dim), lambda i, k: (i, 0)),
        out_shape=jax.ShapeDtypeStruct((n_pad, embed_dim), table.dtype),
        scratch_shapes=[pltpu.VMEM((t, embed_dim), jnp.float32)],
        compiler_params=pltpu.CompilerParams(
            dimension_semantics=("parallel", "arbitrary"),
            vmem_limit_bytes=vmem_limit,
        ),
    )(ids_2d, table_p)

    return out[:n]


# ---------------------------------------------------------------------------
# Module-equivalent wrappers (plain Python glue around the kernel)
# ---------------------------------------------------------------------------
class SimpleCaptionEncoder:
    """Equivalent of nn.Embedding(vocab_size, embed_dim) forward."""

    def __init__(self, vocab_size, embed_dim, key):
        # Deterministic synthetic weights (nn.Embedding-style init, scaled).
        self.embedding = (
            jax.random.normal(key, (vocab_size, embed_dim), dtype=jnp.float32) * 0.02
        )

    def __call__(self, x):
        # x: (B, S) int32 token ids -> (B, S, D)
        b, s = x.shape
        flat = embedding_lookup(x.reshape(b * s), self.embedding)
        return flat.reshape(b, s, self.embedding.shape[1])


class CaptionEncoder:
    def __init__(self, encoder_type, vocab_size, embed_dim, key):
        if encoder_type == "simple":
            self.encoder = SimpleCaptionEncoder(vocab_size, embed_dim, key)
        elif encoder_type == "roberta":
            # TODO(synk): pretrained RoBERTa backbone not implemented
            # (requires loading roberta-base checkpoint).
            raise NotImplementedError("roberta branch not implemented")
        else:
            raise ValueError(f"Invalid encoder type: {encoder_type}")

    def __call__(self, x):
        return self.encoder(x)


# ---------------------------------------------------------------------------
# Demo / self-check
# ---------------------------------------------------------------------------
if __name__ == "__main__":
    key = jax.random.PRNGKey(0)
    k_ids, k_emb = jax.random.split(key)

    batch, seq = 2, 8
    vocab_size, embed_dim = 256, 128

    x = jax.random.randint(
        k_ids, (batch, seq), minval=0, maxval=vocab_size, dtype=jnp.int32
    )

    model = CaptionEncoder("simple", vocab_size, embed_dim, k_emb)

    out = jax.block_until_ready(model(x))

    # Reference check against a plain-JAX embedding lookup.
    ref = model.encoder.embedding[x]
    assert out.shape == (batch, seq, embed_dim), out.shape
    assert jnp.allclose(out, ref), "Pallas embedding gather mismatch"

    print("KERNEL_OK")
</pallas_src>

<mosaic_0001>
module attributes {stable_mosaic.version = 11 : i64} {
  func.func @_embedding_onehot_kernel(%arg0: i32, %arg1: i32, %arg2: memref<16x1xi32, #tpu.memory_space<vmem>>, %arg3: memref<256x128xf32, #tpu.memory_space<vmem>>, %arg4: memref<16x128xf32, #tpu.memory_space<vmem>>, %arg5: memref<16x128xf32, #tpu.memory_space<vmem>>) attributes {dimension_semantics = [#tpu.dimension_semantics<parallel>, #tpu.dimension_semantics<arbitrary>], iteration_bounds = array<i64: 1, 1>, scalar_prefetch = 0 : i64, scratch_operands = 1 : i64, tpu.core_type = #tpu.core_type<tc>, window_params = [{transform_indices = @transform_0, window_bounds = array<i64: 16, 1>}, {transform_indices = @transform_1, window_bounds = array<i64: 256, 128>}, {transform_indices = @transform_2, window_bounds = array<i64: 16, 128>}]} {
    %c0_i32 = arith.constant 0 : i32
    %0 = arith.cmpi eq, %arg1, %c0_i32 : i32
    %1 = arith.extui %0 : i1 to i32
    %c0_i32_0 = arith.constant 0 : i32
    %2 = arith.cmpi ne, %1, %c0_i32_0 : i32
    scf.if %2 {
      %cst_10 = arith.constant 0.000000e+00 : f32
      %20 = vector.broadcast %cst_10 : f32 to vector<16x128xf32>
      %c0_11 = arith.constant 0 : index
      %c0_12 = arith.constant 0 : index
      %21 = vector.load %arg5[%c0_11, %c0_12] : memref<16x128xf32, #tpu.memory_space<vmem>>, vector<16x128xf32>
      tpu.vector_store %arg5[%c0_11, %c0_12], %20 {strides = array<i32>} : memref<16x128xf32, #tpu.memory_space<vmem>>, vector<16x128xf32>,
    } else {
    }
    %c0 = arith.constant 0 : index
    %c0_1 = arith.constant 0 : index
    %3 = vector.load %arg2[%c0, %c0_1] : memref<16x1xi32, #tpu.memory_space<vmem>>, vector<16x1xi32>
    %c256_i32 = arith.constant 256 : i32
    %4 = arith.muli %arg1, %c256_i32 : i32
    %5 = tpu.iota {dimensions = array<i32: 1>} : vector<16x256xi32>
    %6 = vector.broadcast %4 : i32 to vector<16x256xi32>
    %7 = arith.addi %6, %5 : vector<16x256xi32>
    %8 = vector.broadcast %3 : vector<16x1xi32> to vector<16x256xi32>
    %9 = arith.cmpi eq, %8, %7 : vector<16x256xi32>
    %10 = arith.extui %9 : vector<16x256xi1> to vector<16x256xi32>
    %11 = arith.sitofp %10 : vector<16x256xi32> to vector<16x256xf32>
    %c0_2 = arith.constant 0 : index
    %c0_3 = arith.constant 0 : index
    %12 = vector.load %arg5[%c0_2, %c0_3] : memref<16x128xf32, #tpu.memory_space<vmem>>, vector<16x128xf32>
    %c0_4 = arith.constant 0 : index
    %c0_5 = arith.constant 0 : index
    %13 = vector.load %arg3[%c0_4, %c0_5] : memref<256x128xf32, #tpu.memory_space<vmem>>, vector<256x128xf32>
    %cst = arith.constant dense<0.000000e+00> : vector<16x128xf32>
    %14 = tpu.matmul %11, %13, %cst {dimension_numbers = #tpu.dot_dimension_numbers<[1], [0], [0], [1], [0, 0, 1, 1], [], []>} : vector<16x256xf32>, vector<256x128xf32>, vector<16x128xf32> -> vector<16x128xf32>
    %15 = arith.addf %12, %14 : vector<16x128xf32>
    %c0_6 = arith.constant 0 : index
    %c0_7 = arith.constant 0 : index
    %16 = vector.load %arg5[%c0_6, %c0_7] : memref<16x128xf32, #tpu.memory_space<vmem>>, vector<16x128xf32>
    tpu.vector_store %arg5[%c0_6, %c0_7], %15 {strides = array<i32>} : memref<16x128xf32, #tpu.memory_space<vmem>>, vector<16x128xf32>,
    %c0_i32_8 = arith.constant 0 : i32
    %17 = arith.cmpi eq, %arg1, %c0_i32_8 : i32
    %18 = arith.extui %17 : i1 to i32
    %c0_i32_9 = arith.constant 0 : i32
    %19 = arith.cmpi ne, %18, %c0_i32_9 : i32
    scf.if %19 {
      %c0_10 = arith.constant 0 : index
      %c0_11 = arith.constant 0 : index
      %20 = vector.load %arg5[%c0_10, %c0_11] : memref<16x128xf32, #tpu.memory_space<vmem>>, vector<16x128xf32>
      %c0_12 = arith.constant 0 : index
      %c0_13 = arith.constant 0 : index
      %21 = vector.load %arg4[%c0_12, %c0_13] : memref<16x128xf32, #tpu.memory_space<vmem>>, vector<16x128xf32>
      tpu.vector_store %arg4[%c0_12, %c0_13], %20 {strides = array<i32>} : memref<16x128xf32, #tpu.memory_space<vmem>>, vector<16x128xf32>,
    } else {
    }
    return
  }
  func.func @transform_0(%arg0: i32, %arg1: i32) -> (i32, i32) {
    %c0_i32 = arith.constant 0 : i32
    %c0_i32_0 = arith.constant 0 : i32
    return %arg0, %c0_i32 : i32, i32
  }
  func.func @transform_1(%arg0: i32, %arg1: i32) -> (i32, i32) {
    %c0_i32 = arith.constant 0 : i32
    %c0_i32_0 = arith.constant 0 : i32
    return %arg1, %c0_i32 : i32, i32
  }
  func.func @transform_2(%arg0: i32, %arg1: i32) -> (i32, i32) {
    %c0_i32 = arith.constant 0 : i32
    %c0_i32_0 = arith.constant 0 : i32
    return %arg0, %c0_i32 : i32, i32
  }
}

</mosaic_0001>

<bundles_post_ra>
// kernel: tpu_custom_call.1
= control target key start
LH: loop header
LB: loop body
LE: loop exit
PB: predicated region body
PF: predicated region fallthrough
CT: control target
= control target key end

     0   :  { %7 = vsyncpa [#allocation4], 0  ;;  %s402_s0 = inlined_call_operand.vmem [shape: s32[16,1], index: 0, kind: input, shape index: {}]   ;;  %s403_s1 = inlined_call_operand.hbm [shape: f32[256,128], index: 1, kind: input, shape index: {}]   ;;  %s404_s2 = inlined_call_operand.hbm [shape: f32[16,128], index: 2, kind: output, shape index: {}]  }
   0x1   :  { %8 = vsyncpa [#allocation5], 0  ;;  %s345_s9 = smov [#allocation3]   ;;  %s297_s13 = scalar_lea.hbm %s403_s1, 4096 }
   0x2   :  { %s16_s10 = sshll.u32 %s345_s9, 4  ;;  %p298_p0 = scmp.ne.s32.totalorder %s403_s1, %s297_s13  ;;  %s17_s10 = int_to_ptr.vmem [resolvable:$true] %s16_s10 }
   0x3   :  { %p301_p1 = scmp.lt.u32.totalorder %s297_s13, %s403_s1 }
   0x5   :  { %p303_p2 = pnand %p301_p1, %p298_p0 }
   0x7   :  { %306 = shalt.err (!%p303_p2)
}
   0x8   :  { %s307_s18 = scalar_lea.vmem %s17_s10, 4096  ;;  %p312_p4 = scmp.lt.s32.totalorder %s17_s10, %s17_s10 }
   0x9   :  { %p308_p3 = scmp.ne.s32.totalorder %s17_s10, %s307_s18  ;;  %p313_p5 = scmp.lt.s32.totalorder %s307_s18, %s307_s18 }
   0xb   :  { %p314_p6 = por %p313_p5, %p312_p4 }
   0xd   :  { %p315_p7 = pnand %p314_p6, %p308_p3 }
   0xf   :  { %318 = shalt.err (!%p315_p7)
}
  0x10   :  { %s346_s19 = smov 128   ;;  %s347_s20 = smov 8  }
  0x11   :  { %22 = dma.hbm_to_vmem [thread:$0]  %s403_s1, 4096, %s17_s10, [#allocation4], %s346_s19, %s346_s19, %s347_s20  }
  0x12   :  { %341 = dma.done.wait [#allocation4], 4096  }
  0x13   :  { %342 = vsyncadd [#allocation4], 4294963200  ;;  %v348_v0 = vmov 0   ;;  %v32_v1 = vld [vmem:[%s402_s0] sm:$0xff]  ;;  %v33_v2 = vld [vmem:[%s402_s0 + $0x8] sm:$0xff]  ;;  %v35_v51 = vlaneseq  ;;  %v349_v55 = vmov 1.0  }
  0x14   :  { %296 = vset.pattern.permute.xlu0 %v348_v0  ;;  %v77_v3 = vld [vmem:[#allocation3 + $0x80] sm:$0xff]  ;;  %v78_v4 = vld [vmem:[#allocation3 + $0x88] sm:$0xff]  ;;  %v79_v9 = vld [vmem:[#allocation3 + $0x90] sm:$0xff]  ;;  %s350_s0 = smov [#allocation6]  }
  0x15   :  { %42 = vperm.xlu0 %296, %v32_v1   ;;  %v61_v5 = vld [vmem:[#allocation3] sm:$0xff]  ;;  %v62_v6 = vld [vmem:[#allocation3 + $0x8] sm:$0xff]  ;;  %v242_v7 = vpack.c.bf16 %v78_v4, %v77_v3  ;;  %v80_v10 = vld [vmem:[#allocation3 + $0x98] sm:$0xff]  ;;  %v36_v52 = vand.u32 127, %v35_v51  ;;  %s184_s1 = sshll.u32 %s350_s0, 4  ;;  %s185_s1 = int_to_ptr.vmem [resolvable:$true] %s184_s1 }
  0x16   :  { %v244_v8 = vpack.c.bf16 %v62_v6, %v61_v5  ;;  %v63_v11 = vld [vmem:[#allocation3 + $0x10] sm:$0xff]  ;;  %v246_v12 = vpack.c.bf16 %v80_v10, %v79_v9  ;;  %v64_v13 = vld [vmem:[#allocation3 + $0x18] sm:$0xff]  ;;  %v81_v14 = vld [vmem:[#allocation3 + $0xa0] sm:$0xff]  ;;  %s319_s27 = scalar_lea.vmem %s185_s1, 256  ;;  %p324_p9 = scmp.lt.s32.totalorder %s185_s1, %s185_s1 }
  0x17   :  { %v82_v15 = vld [vmem:[#allocation3 + $0xa8] sm:$0xff]  ;;  %243 = vmatprep.subr.bf16.mxu0 %v242_v7  ;;  %274 = vmatprep.subr.bf16.mxu1 %v242_v7  ;;  %v248_v16 = vpack.c.bf16 %v64_v13, %v63_v11  ;;  %v65_v18 = vld [vmem:[#allocation3 + $0x20] sm:$0xff]  ;;  %v83_v20 = vld [vmem:[#allocation3 + $0xb0] sm:$0xff]  ;;  %v37_v53 = vadd.s32 128, %v36_v52  ;;  %p320_p8 = scmp.ne.s32.totalorder %s185_s1, %s319_s27  ;;  %p325_p10 = scmp.lt.s32.totalorder %s319_s27, %s319_s27 }
  0x18   :  { %245 = vmatpush3.bf16.msra.mxu0 %v244_v8  ;;  %282 = vmatpush3.bf16.msra.mxu1 %v244_v8  ;;  %v250_v17 = vpack.c.bf16 %v82_v15, %v81_v14  ;;  %v66_v19 = vld [vmem:[#allocation3 + $0x28] sm:$0xff]  ;;  %v84_v21 = vld [vmem:[#allocation3 + $0xb8] sm:$0xff]  ;;  %v67_v24 = vld [vmem:[#allocation3 + $0x30] sm:$0xff] }
  0x19   :  { %45 = vperm.xlu0 %296, %v33_v2   ;;  %247 = vmatprep.subr.bf16.mxu0 %v246_v12  ;;  %v252_v22 = vpack.c.bf16 %v66_v19, %v65_v18  ;;  %v254_v23 = vpack.c.bf16 %v84_v21, %v83_v20  ;;  %v68_v25 = vld [vmem:[#allocation3 + $0x38] sm:$0xff]  ;;  %v85_v26 = vld [vmem:[#allocation3 + $0xc0] sm:$0xff]  ;;  %v86_v27 = vld [vmem:[#allocation3 + $0xc8] sm:$0xff]  ;;  %p326_p11 = por %p325_p10, %p324_p9 }
  0x1a   :  { %275 = vmatprep.subr.bf16.mxu1 %v246_v12  ;;  %v256_v28 = vpack.c.bf16 %v68_v25, %v67_v24  ;;  %v258_v29 = vpack.c.bf16 %v86_v27, %v85_v26  ;;  %v69_v30 = vld [vmem:[#allocation3 + $0x40] sm:$0xff]  ;;  %v70_v31 = vld [vmem:[#allocation3 + $0x48] sm:$0xff]  ;;  %v87_v32 = vld [vmem:[#allocation3 + $0xd0] sm:$0xff] }
  0x1b   :  { %v88_v33 = vld [vmem:[#allocation3 + $0xd8] sm:$0xff]  ;;  %v260_v34 = vpack.c.bf16 %v70_v31, %v69_v30  ;;  %v71_v36 = vld [vmem:[#allocation3 + $0x50] sm:$0xff]  ;;  %v89_v38 = vld [vmem:[#allocation3 + $0xe0] sm:$0xff]  ;;  %p327_p12 = pnand %p326_p11, %p320_p8 }
  0x1c   :  { %249 = vmatpush3.bf16.msra.mxu0 %v248_v16  ;;  %283 = vmatpush3.bf16.msra.mxu1 %v248_v16  ;;  %v262_v35 = vpack.c.bf16 %v88_v33, %v87_v32  ;;  %v72_v37 = vld [vmem:[#allocation3 + $0x58] sm:$0xff]  ;;  %v90_v39 = vld [vmem:[#allocation3 + $0xe8] sm:$0xff]  ;;  %v73_v42 = vld [vmem:[#allocation3 + $0x60] sm:$0xff] }
  0x1d   :  { %251 = vmatprep.subr.bf16.mxu0 %v250_v17  ;;  %276 = vmatprep.subr.bf16.mxu1 %v250_v17  ;;  %v264_v40 = vpack.c.bf16 %v72_v37, %v71_v36  ;;  %v266_v41 = vpack.c.bf16 %v90_v39, %v89_v38  ;;  %v74_v43 = vld [vmem:[#allocation3 + $0x68] sm:$0xff]  ;;  %v91_v44 = vld [vmem:[#allocation3 + $0xf0] sm:$0xff]  ;;  %v92_v45 = vld [vmem:[#allocation3 + $0xf8] sm:$0xff] }
  0x1e   :  { %v268_v46 = vpack.c.bf16 %v74_v43, %v73_v42  ;;  %v270_v47 = vpack.c.bf16 %v92_v45, %v91_v44  ;;  %v75_v48 = vld [vmem:[#allocation3 + $0x70] sm:$0xff]  ;;  %v76_v49 = vld [vmem:[#allocation3 + $0x78] sm:$0xff] }
  0x1f   :  { %v272_v50 = vpack.c.bf16 %v76_v49, %v75_v48 }
  0x20   :  { %253 = vmatpush3.bf16.msra.mxu0 %v252_v22  ;;  %284 = vmatpush3.bf16.msra.mxu1 %v252_v22 }
  0x21   :  { %255 = vmatprep.subr.bf16.mxu0 %v254_v23  ;;  %277 = vmatprep.subr.bf16.mxu1 %v254_v23 }
  0x24   :  { %257 = vmatpush3.bf16.msra.mxu0 %v256_v28  ;;  %285 = vmatpush3.bf16.msra.mxu1 %v256_v28 }
  0x25   :  { %259 = vmatprep.subr.bf16.mxu0 %v258_v29  ;;  %278 = vmatprep.subr.bf16.mxu1 %v258_v29 }
  0x28   :  { %261 = vmatpush3.bf16.msra.mxu0 %v260_v34  ;;  %286 = vmatpush3.bf16.msra.mxu1 %v260_v34 }
  0x29   :  { %263 = vmatprep.subr.bf16.mxu0 %v262_v35  ;;  %279 = vmatprep.subr.bf16.mxu1 %v262_v35 }
  0x2c   :  { %265 = vmatpush3.bf16.msra.mxu0 %v264_v40  ;;  %287 = vmatpush3.bf16.msra.mxu1 %v264_v40 }
  0x2d   :  { %267 = vmatprep.subr.bf16.mxu0 %v266_v41  ;;  %280 = vmatprep.subr.bf16.mxu1 %v266_v41 }
  0x30   :  { %269 = vmatpush3.bf16.msra.mxu0 %v268_v46  ;;  %288 = vmatpush3.bf16.msra.mxu1 %v268_v46 }
  0x31   :  { %271 = vmatprep.subr.bf16.mxu0 %v270_v47  ;;  %281 = vmatprep.subr.bf16.mxu1 %v270_v47 }
  0x34   :  { %273 = vmatpush3.bf16.msra.mxu0 %v272_v50  ;;  %289 = vmatpush3.bf16.msra.mxu1 %v272_v50 }
  0x94   :  { %v43_v54 = vpop.permute.xlu0 %42 }
  0x95   :  { %vm47_vm0 = vcmp.eq.s32.totalorder %v43_v54, %v36_v52  ;;  %vm48_vm1 = vcmp.eq.s32.totalorder %v43_v54, %v37_v53 }
  0x96   :  { %200 = vmatprep.mubr.msk.f32.mxu0 %vm48_vm1, %v349_v55 }
  0x97   :  { %201 = vmatmul.mubr.msk.f32.vlgmr.msra.gmra.mrb[0].mxu0 %vm47_vm0, %v349_v55 }
  0x98   :  { %v46_v56 = vpop.permute.xlu0 %45 }
  0x99   :  { %vm49_vm2 = vcmp.eq.s32.totalorder %v46_v56, %v36_v52  ;;  %vm50_vm3 = vcmp.eq.s32.totalorder %v46_v56, %v37_v53 }
  0x9a   :  { %202 = vmatprep.mubr.msk.f32.mxu1 %vm50_vm3, %v349_v55 }
  0x9b   :  { %203 = vmatmul.mubr.msk.f32.vlgmr.msra.gmra.mrb[0].mxu1 %vm49_vm2, %v349_v55 }
 0x16a   :  { %v236_v57 = vpop.f32.mrb[0].mxu0 }
 0x16b   :  { %v237_v58 = vpop.f32.mrb[1].mxu0 }
 0x16c   :  { %v238_v59 = vadd.f32 %v237_v58, %v236_v57 }
 0x16e   :  { %177 = vst [vmem:[#allocation6] sm:$0xff] %v238_v59  ;;  %v239_v60 = vpop.f32.mrb[0].mxu1 }
 0x16f   :  { %v240_v61 = vpop.f32.mrb[1].mxu1 }
 0x170   :  { %v241_v62 = vadd.f32 %v240_v61, %v239_v60 }
 0x172   :  { %178 = vst [vmem:[#allocation6 + $0x8] sm:$0xff] %v241_v62 }
 0x173   :  { %330 = shalt.err (!%p327_p12)
}
 0x174   :  { %s331_s30 = scalar_lea.hbm %s404_s2, 256 }
 0x175   :  { %p332_p13 = scmp.ne.s32.totalorder %s404_s2, %s331_s30  ;;  %p335_p0 = scmp.lt.u32.totalorder %s331_s30, %s404_s2 }
 0x177   :  { %p337_p1 = pnand %p335_p0, %p332_p13 }
 0x179   :  { %340 = shalt.err (!%p337_p1)
}
 0x17a   :  { %190 = dma.vmem_to_hbm [thread:$0]  %s185_s1, 256, %s404_s2, [#allocation5], %s346_s19, %s346_s19, %s347_s20  }
 0x17b   :  { %343 = dma.done.wait [#allocation5], 256  }
 0x17c   :  { %344 = vsyncadd [#allocation5], 4294967040 }
 0x17d   :  { %194 = vsyncpa [#allocation4], 1 }
 0x17e   :  { %195 = vsyncpa [#allocation5], 1 }

</bundles_post_ra>
